<compile_context>
chip_gen: v7x
topology: tpu7x:2x2x1
jax: 0.10.0
libtpu: 0.0.40
codegen_flags: <defaults>
</compile_context>

<pallas_src>
import functools
import math

import jax
import jax.numpy as jnp
from jax import lax
from jax.experimental import pallas as pl
from jax.experimental.pallas import tpu as pltpu

FLT_MIN = 1.1754943508222875e-38           # float32 FLT_MIN, as in the CUDA kernel
LOG_FLT_MIN = math.log(FLT_MIN)            # ~ -87.33654


def _round_up(x, m):
    return ((x + m - 1) // m) * m


def _per_sample_loss(x_ref, tgt_ref, wt_ref, *, gamma, alpha, n_rows):
    """Masked per-sample focal-loss column (tn, 1) f32 for the current tile."""
    tile = pl.program_id(0)

    x = x_ref[...]                                       # (tn, C) native dtype
    tgt = tgt_ref[...]                                   # (tn, 1) int32
    tn = x.shape[0]

    cls = lax.broadcasted_iota(jnp.int32, x.shape, 1)    # (tn, C)
    is_t = cls == tgt                                    # (tn, C) bool

    # Row max and target-logit gather on the native-dtype tile (bf16 stays bf16).
    m = jnp.max(x, axis=1, keepdims=True)                                  # (tn,1)
    x_t = jnp.sum(jnp.where(is_t, x, jnp.zeros_like(x)),
                  axis=1, keepdims=True)                                   # (tn,1)

    # Streaming exp-sum: (x - m) is single-use -> cast -> exp -> reduce.
    s = jnp.sum(jnp.exp((x - m).astype(jnp.float32)),
                axis=1, keepdims=True)                                     # (tn,1)

    m32 = m.astype(jnp.float32)
    x_t32 = x_t.astype(jnp.float32)

    # log-sum-exp form: log p_t = (x_t - m) - log s   (column EUP ops only).
    log_p = (x_t32 - m32) - jnp.log(s)
    log_p = jnp.maximum(log_p, LOG_FLT_MIN)   # mirrors CUDA log(max(p, FLT_MIN))
    p_t = jnp.exp(log_p)                      # <= 1 for valid rows, no reciprocal
    omp = jnp.maximum(1.0 - p_t, 0.0)         # guard fp rounding for jnp.power

    g = float(gamma)
    if g == 0.0:
        mod = jnp.ones_like(p_t)
    elif g == 1.0:
        mod = omp
    elif g == 2.0:                            # common case: plain VPU muls
        mod = omp * omp
    else:
        mod = jnp.power(omp, jnp.float32(g))

    loss = (-float(alpha)) * mod * log_p                                   # (tn,1)

    if wt_ref is not None:
        loss = loss * wt_ref[...].astype(jnp.float32)    # per-sample weight column

    # Mask ignored labels (< 0) and ragged rows beyond the true N.
    row = lax.broadcasted_iota(jnp.int32, (tn, 1), 0) + tile * tn
    keep = jnp.logical_and(tgt >= 0, row < n_rows)
    return jnp.where(keep, loss, 0.0)                                      # (tn,1)


def _make_kernel(*, partial_sum, gamma, alpha, n_rows, has_weight):
    def kernel(*refs):
        x_ref, tgt_ref = refs[0], refs[1]
        wt_ref = refs[2] if has_weight else None
        out_ref = refs[-1]
        loss = _per_sample_loss(x_ref, tgt_ref, wt_ref,
                                gamma=gamma, alpha=alpha, n_rows=n_rows)
        if partial_sum:
            # One tiny lane-dense partial sum per tile; no per-sample writeback.
            out_ref[...] = jnp.full(out_ref.shape, jnp.sum(loss),
                                    dtype=out_ref.dtype)
        else:
            # Lane-dense per-sample output: (tn,1) column -> (1,1,tn) row block.
            out_ref[...] = jnp.transpose(loss, (1, 0)).reshape(
                out_ref.shape).astype(out_ref.dtype)
    return kernel


def softmax_focal_loss(logits, target, gamma=2.0, alpha=0.25,
                       weight=None, reduction='mean'):
    """Pallas TPU implementation of the mmcv softmax focal loss forward pass."""
    assert logits.ndim == 2 and target.ndim == 1
    N, C = logits.shape
    assert target.shape[0] == N
    assert reduction in ('none', 'mean', 'sum')

    out_dtype = logits.dtype
    itemsize = jnp.dtype(logits.dtype).itemsize

    tgt_col = target.astype(jnp.int32).reshape(N, 1)
    has_weight = weight is not None
    if has_weight:
        w = jnp.asarray(weight, jnp.float32)
        assert w.shape == (C,)
        # O(N) gather done in XLA; kernel only sees the per-sample column.
        wt_col = w[jnp.clip(tgt_col[:, 0], 0, C - 1)].reshape(N, 1)

    # --- VMEM-aware tile sizing -------------------------------------------
    # Scoped-VMEM cap adapts to the chip (v7x: 64 MiB phys -> ~48 MiB cap;
    # v5e/v6e: 128 MiB -> up to 96 MiB so wide-C inputs keep large tiles).
    vmem_cap = 64 * 1024 * 1024
    try:
        info = pltpu.get_tpu_info()
        vmem_cap = int(getattr(info, "vmem_capacity_bytes", vmem_cap))
    except Exception:
        pass
    vmem_limit = max(32 * 1024 * 1024, min((vmem_cap * 3) // 4, 96 * 1024 * 1024))
    tile_budget = max(8 * 1024 * 1024, vmem_limit - 8 * 1024 * 1024)

    # Budget against the real working set: double-buffered native input tile
    # plus ~1.5 f32 tile equivalents of in-kernel temporaries/spill headroom.
    bytes_per_row = 2 * C * itemsize + (3 * C * 4) // 2 + 64
    cap = max(8, tile_budget // bytes_per_row)
    cap = (cap // 128) * 128 if cap >= 128 else (cap // 8) * 8
    cap = max(8, min(1024, cap))                  # no hard 128-row floor anymore
    tn = int(min(cap, _round_up(N, 8)))
    num_tiles = (N + tn - 1) // tn

    in_specs = [
        pl.BlockSpec((tn, C), lambda i: (i, 0)),  # logits tile (original dtype)
        pl.BlockSpec((tn, 1), lambda i: (i, 0)),  # int32 labels column
    ]
    inputs = [logits, tgt_col]
    if has_weight:
        in_specs.append(pl.BlockSpec((tn, 1), lambda i: (i, 0)))
        inputs.append(wt_col)

    out_elems = N if reduction == 'none' else num_tiles * 128
    cost = pl.CostEstimate(
        flops=int(6 * N * C),
        transcendentals=int(N * C + 3 * N),
        bytes_accessed=int(N * C * itemsize + N * 4
                           + (N * 4 if has_weight else 0) + out_elems * 4),
    )
    compiler_params = pltpu.CompilerParams(
        dimension_semantics=("parallel",),        # no cross-tile state
        vmem_limit_bytes=int(vmem_limit))

    common = dict(gamma=float(gamma), alpha=float(alpha),
                  n_rows=N, has_weight=has_weight)

    if reduction == 'none':
        kernel = _make_kernel(partial_sum=False, **common)
        losses = pl.pallas_call(
            kernel,
            out_shape=jax.ShapeDtypeStruct((num_tiles, 1, tn), jnp.float32),
            grid_spec=pltpu.PrefetchScalarGridSpec(
                num_scalar_prefetch=0,
                grid=(num_tiles,),
                in_specs=in_specs,
                out_specs=pl.BlockSpec((1, 1, tn), lambda i: (i, 0, 0)),
            ),
            compiler_params=compiler_params,
            cost_estimate=cost,
        )(*inputs)
        return losses.reshape(num_tiles * tn)[:N].astype(out_dtype)

    kernel = _make_kernel(partial_sum=True, **common)
    partials = pl.pallas_call(
        kernel,
        out_shape=jax.ShapeDtypeStruct((num_tiles, 1, 128), jnp.float32),
        grid_spec=pltpu.PrefetchScalarGridSpec(
            num_scalar_prefetch=0,
            grid=(num_tiles,),
            in_specs=in_specs,
            out_specs=pl.BlockSpec((1, 1, 128), lambda i: (i, 0, 0)),
        ),
        compiler_params=compiler_params,
        cost_estimate=cost,
    )(*inputs)

    total = jnp.sum(partials[:, 0, 0])
    if reduction == 'mean':
        total = total / jnp.float32(N)
    return total.astype(out_dtype)


class SoftmaxFocalLoss:
    """Forward-only mirror of the PyTorch nn.Module."""

    def __init__(self, gamma, alpha, weight=None, reduction='mean'):
        self.gamma = gamma
        self.alpha = alpha
        self.weight = weight            # optional (C,) buffer
        self.reduction = reduction

    def __call__(self, input, target):
        return softmax_focal_loss(input, target, self.gamma, self.alpha,
                                  self.weight, self.reduction)


def _reference(logits, target, gamma, alpha, weight, reduction):
    x = logits.astype(jnp.float32)
    sm = jax.nn.softmax(x, axis=1)
    safe_t = jnp.clip(target, 0, None)
    p_t = jnp.take_along_axis(sm, safe_t[:, None], axis=1)[:, 0]
    if weight is None:
        w_t = jnp.ones_like(p_t)
    else:
        w_t = jnp.asarray(weight, jnp.float32)[safe_t]
    loss = -alpha * (1.0 - p_t) ** gamma * jnp.log(jnp.maximum(p_t, FLT_MIN)) * w_t
    loss = jnp.where(target >= 0, loss, 0.0)
    if reduction == 'mean':
        return jnp.sum(loss) / logits.shape[0]
    if reduction == 'sum':
        return jnp.sum(loss)
    return loss


if __name__ == "__main__":
    key = jax.random.PRNGKey(0)
    k1, k2 = jax.random.split(key)

    N, C = 16, 8                          # small smoke-test shapes
    logits = jax.random.normal(k1, (N, C), dtype=jnp.float32)
    target = jax.random.randint(k2, (N,), 0, C, dtype=jnp.int32)
    target = target.at[3].set(-1)         # one ignored sample (label < 0)
    weight = jnp.linspace(0.5, 1.5, C, dtype=jnp.float32)

    module = SoftmaxFocalLoss(gamma=2.0, alpha=0.25, weight=weight, reduction='mean')
    out_mean = jax.block_until_ready(module(logits, target))
    ref_mean = _reference(logits, target, 2.0, 0.25, weight, 'mean')
    assert jnp.allclose(out_mean, ref_mean, rtol=2e-3, atol=1e-5), (out_mean, ref_mean)

    out_none = jax.block_until_ready(
        softmax_focal_loss(logits, target, 2.0, 0.25, weight, 'none'))
    ref_none = _reference(logits, target, 2.0, 0.25, weight, 'none')
    assert jnp.allclose(out_none, ref_none, rtol=2e-3, atol=1e-5), (out_none, ref_none)

    out_sum = jax.block_until_ready(
        softmax_focal_loss(logits, target, 2.0, 0.25, None, 'sum'))
    ref_sum = _reference(logits, target, 2.0, 0.25, None, 'sum')
    assert jnp.allclose(out_sum, ref_sum, rtol=2e-3, atol=1e-5), (out_sum, ref_sum)

    # Non-integer gamma exercises the jnp.power path (clamped 1-p >= 0).
    out_g = jax.block_until_ready(
        softmax_focal_loss(logits, target, 1.5, 0.5, weight, 'mean'))
    ref_g = _reference(logits, target, 1.5, 0.5, weight, 'mean')
    assert jnp.allclose(out_g, ref_g, rtol=2e-3, atol=1e-5), (out_g, ref_g)

    print("KERNEL_OK")
</pallas_src>

<mosaic_0001>
module attributes {stable_mosaic.version = 11 : i64} {
  func.func @kernel(%arg0: i32, %arg1: memref<16x8xf32, #tpu.memory_space<vmem>>, %arg2: memref<16x1xi32, #tpu.memory_space<vmem>>, %arg3: memref<16x1xf32, #tpu.memory_space<vmem>>, %arg4: memref<1x1x128xf32, #tpu.memory_space<vmem>>) attributes {dimension_semantics = [#tpu.dimension_semantics<parallel>], iteration_bounds = array<i64: 1>, scalar_prefetch = 0 : i64, scratch_operands = 0 : i64, tpu.core_type = #tpu.core_type<tc>, window_params = [{transform_indices = @transform_0, window_bounds = array<i64: 16, 8>}, {transform_indices = @transform_1, window_bounds = array<i64: 16, 1>}, {transform_indices = @transform_2, window_bounds = array<i64: 16, 1>}, {transform_indices = @transform_3, window_bounds = array<i64: 1, 1, 128>}]} {
    %c0 = arith.constant 0 : index
    %c0_0 = arith.constant 0 : index
    %0 = vector.load %arg1[%c0, %c0_0] : memref<16x8xf32, #tpu.memory_space<vmem>>, vector<16x8xf32>
    %c0_1 = arith.constant 0 : index
    %c0_2 = arith.constant 0 : index
    %1 = vector.load %arg2[%c0_1, %c0_2] : memref<16x1xi32, #tpu.memory_space<vmem>>, vector<16x1xi32>
    %2 = tpu.iota {dimensions = array<i32: 1>} : vector<16x8xi32>
    %3 = vector.broadcast %1 : vector<16x1xi32> to vector<16x8xi32>
    %4 = arith.cmpi eq, %2, %3 : vector<16x8xi32>
    %cst = arith.constant dense<0xFF800000> : vector<16xf32>
    %5 = vector.multi_reduction <maximumf>, %0, %cst [1] : vector<16x8xf32> to vector<16xf32>
    %6 = vector.shape_cast %5 : vector<16xf32> to vector<16x1xf32>
    %cst_3 = arith.constant 0.000000e+00 : f32
    %7 = vector.broadcast %cst_3 : f32 to vector<16x8xf32>
    %8 = arith.select %4, %0, %7 : vector<16x8xi1>, vector<16x8xf32>
    %cst_4 = arith.constant dense<0.000000e+00> : vector<16xf32>
    %9 = vector.multi_reduction <add>, %8, %cst_4 [1] : vector<16x8xf32> to vector<16xf32>
    %10 = vector.shape_cast %9 : vector<16xf32> to vector<16x1xf32>
    %11 = vector.broadcast %6 : vector<16x1xf32> to vector<16x8xf32>
    %12 = arith.subf %0, %11 : vector<16x8xf32>
    %13 = math.exp %12 : vector<16x8xf32>
    %cst_5 = arith.constant dense<0.000000e+00> : vector<16xf32>
    %14 = vector.multi_reduction <add>, %13, %cst_5 [1] : vector<16x8xf32> to vector<16xf32>
    %15 = vector.shape_cast %14 : vector<16xf32> to vector<16x1xf32>
    %16 = arith.subf %10, %6 : vector<16x1xf32>
    %17 = math.log %15 : vector<16x1xf32>
    %18 = arith.subf %16, %17 : vector<16x1xf32>
    %cst_6 = arith.constant -87.3365478 : f32
    %19 = vector.broadcast %cst_6 : f32 to vector<16x1xf32>
    %20 = arith.maximumf %18, %19 : vector<16x1xf32>
    %21 = math.exp %20 : vector<16x1xf32>
    %cst_7 = arith.constant 1.000000e+00 : f32
    %22 = vector.broadcast %cst_7 : f32 to vector<16x1xf32>
    %23 = arith.subf %22, %21 : vector<16x1xf32>
    %cst_8 = arith.constant 0.000000e+00 : f32
    %24 = vector.broadcast %cst_8 : f32 to vector<16x1xf32>
    %25 = arith.maximumf %23, %24 : vector<16x1xf32>
    %26 = arith.mulf %25, %25 : vector<16x1xf32>
    %cst_9 = arith.constant -2.500000e-01 : f32
    %27 = vector.broadcast %cst_9 : f32 to vector<16x1xf32>
    %28 = arith.mulf %27, %26 : vector<16x1xf32>
    %29 = arith.mulf %28, %20 : vector<16x1xf32>
    %c0_10 = arith.constant 0 : index
    %c0_11 = arith.constant 0 : index
    %30 = vector.load %arg3[%c0_10, %c0_11] : memref<16x1xf32, #tpu.memory_space<vmem>>, vector<16x1xf32>
    %31 = arith.mulf %29, %30 : vector<16x1xf32>
    %32 = tpu.iota {dimensions = array<i32: 0>} : vector<16x1xi32>
    %c16_i32 = arith.constant 16 : i32
    %33 = arith.muli %arg0, %c16_i32 : i32
    %34 = vector.broadcast %33 : i32 to vector<16x1xi32>
    %35 = arith.addi %32, %34 : vector<16x1xi32>
    %c0_i32 = arith.constant 0 : i32
    %36 = vector.broadcast %c0_i32 : i32 to vector<16x1xi32>
    %37 = arith.cmpi sge, %1, %36 : vector<16x1xi32>
    %c16_i32_12 = arith.constant 16 : i32
    %38 = vector.broadcast %c16_i32_12 : i32 to vector<16x1xi32>
    %39 = arith.cmpi slt, %35, %38 : vector<16x1xi32>
    %40 = arith.andi %37, %39 : vector<16x1xi1>
    %cst_13 = arith.constant 0.000000e+00 : f32
    %41 = vector.broadcast %cst_13 : f32 to vector<16x1xf32>
    %42 = arith.select %40, %31, %41 : vector<16x1xi1>, vector<16x1xf32>
    %43 = vector.shape_cast %42 : vector<16x1xf32> to vector<1x16x1xf32>
    %cst_14 = arith.constant dense<0.000000e+00> : vector<1xf32>
    %44 = vector.multi_reduction <add>, %43, %cst_14 [1, 2] : vector<1x16x1xf32> to vector<1xf32>
    %45 = vector.shape_cast %44 : vector<1xf32> to vector<1x1x1xf32>
    %46 = vector.extract %45[0, 0, 0] : f32 from vector<1x1x1xf32>
    %47 = vector.broadcast %46 : f32 to vector<1x1x128xf32>
    %c0_15 = arith.constant 0 : index
    %c0_16 = arith.constant 0 : index
    %c0_17 = arith.constant 0 : index
    %48 = vector.load %arg4[%c0_15, %c0_16, %c0_17] : memref<1x1x128xf32, #tpu.memory_space<vmem>>, vector<1x1x128xf32>
    tpu.vector_store %arg4[%c0_15, %c0_16, %c0_17], %47 {strides = array<i32>} : memref<1x1x128xf32, #tpu.memory_space<vmem>>, vector<1x1x128xf32>,
    return
  }
  func.func @transform_0(%arg0: i32) -> (i32, i32) {
    %c0_i32 = arith.constant 0 : i32
    %c0_i32_0 = arith.constant 0 : i32
    return %arg0, %c0_i32 : i32, i32
  }
  func.func @transform_1(%arg0: i32) -> (i32, i32) {
    %c0_i32 = arith.constant 0 : i32
    %c0_i32_0 = arith.constant 0 : i32
    return %arg0, %c0_i32 : i32, i32
  }
  func.func @transform_2(%arg0: i32) -> (i32, i32) {
    %c0_i32 = arith.constant 0 : i32
    %c0_i32_0 = arith.constant 0 : i32
    return %arg0, %c0_i32 : i32, i32
  }
  func.func @transform_3(%arg0: i32) -> (i32, i32, i32) {
    %c0_i32 = arith.constant 0 : i32
    %c0_i32_0 = arith.constant 0 : i32
    %c0_i32_1 = arith.constant 0 : i32
    return %arg0, %c0_i32, %c0_i32_0 : i32, i32, i32
  }
}

</mosaic_0001>

<bundles_post_ra>
// kernel: tpu_custom_call.1
= control target key start
LH: loop header
LB: loop body
LE: loop exit
PB: predicated region body
PF: predicated region fallthrough
CT: control target
= control target key end

     0   :  { %vm29_vm0 = vcmask 64512   ;;  %v170_v4 = vmov 0   ;;  %s236_s0 = inlined_call_operand.vmem [shape: f32[16,8], index: 0, kind: input, shape index: {}]   ;;  %s237_s1 = inlined_call_operand.vmem [shape: s32[16,1], index: 1, kind: input, shape index: {}]   ;;  %s238_s2 = inlined_call_operand.vmem [shape: f32[16,1], index: 2, kind: input, shape index: {}]   ;;  %s239_s3 = inlined_call_operand.hbm [shape: f32[1,1,128], index: 3, kind: output, shape index: {}]  }
   0x1   :  { %v15_v0 = vld [vmem:[%s236_s0] sm:$0xff]  ;;  %v16_v1 = vld [vmem:[%s236_s0 + $0x8] sm:$0xff]  ;;  %132 = vset.pattern.permute.xlu1 %v170_v4  ;;  %133 = vset.pattern.permute.xlu0 %v170_v4 }
   0x2   :  { %v201_v2 = vld [vmem:[%s237_s1] sm:$0xff]  ;;  %v30_v3 = vsel %vm29_vm0, %v15_v0, -inf }
   0x3   :  { %8 = vsyncpa [#allocation3], 0  ;;  %31 = vmax.xlane.f32.xlu0 %v30_v3  ;;  %22 = vperm.xlu1 %132, %v201_v2   ;;  %v33_v5 = vsel %vm29_vm0, %v16_v1, -inf  ;;  %v209_v6 = vld [vmem:[%s237_s1 + $0x8] sm:$0xff]  ;;  %v19_v11 = vlaneseq  ;;  %v80_v49 = vld [vmem:[%s238_s2] sm:$0xff]  ;;  %vm91_vm3 = vcmp.ge.s32.totalorder %v201_v2, 0 }
   0x4   :  { %v81_v54 = vld [vmem:[%s238_s2 + $0x8] sm:$0xff]  ;;  %vm92_vm4 = vcmp.ge.s32.totalorder %v209_v6, 0  ;;  %vm99_vm5 = vcmask 7168   ;;  %s171_s2 = smov [#allocation2]  }
   0x5   :  { %v20_v15 = vand.u32 127, %v19_v11  ;;  %s120_s22 = sshll.u32 %s171_s2, 4  ;;  %s121_s22 = int_to_ptr.vmem [resolvable:$true] %s120_s22 }
   0x6   :  { %s146_s24 = scalar_lea.vmem %s121_s22, 16  ;;  %s150_s25 = scalar_lea.vmem %s121_s22, 32 }
   0x7   :  { %34 = vmax.xlane.f32.xlu0 %v33_v5  ;;  %25 = vperm.xlu1 %132, %v209_v6   ;;  %p147_p0 = scmp.ne.s32.totalorder %s121_s22, %s146_s24  ;;  %p151_p1 = scmp.lt.s32.totalorder %s121_s22, %s121_s22 }
   0x8   :  { %p152_p2 = scmp.lt.s32.totalorder %s150_s25, %s146_s24 }
   0xa   :  { %p153_p3 = por %p152_p2, %p151_p1 }
   0xc   :  { %p154_p4 = pnand %p153_p3, %p147_p0 }
  0x82   :  { %v23_v14 = vpop.permute.xlu1 %22 }
  0x83   :  { %vm27_vm1 = vcmp.eq.s32.totalorder %v20_v15, %v23_v14 }
  0x84   :  { %v36_v18 = vsel %vm27_vm1, %v15_v0, 0.0 }
  0x85   :  { %v38_v20 = vsel %vm29_vm0, %v36_v18, 0.0 }
  0x86   :  { %v26_v16 = vpop.permute.xlu1 %25 }
  0x87   :  { %vm28_vm2 = vcmp.eq.s32.totalorder %v20_v15, %v26_v16 }
  0x88   :  { %v37_v22 = vsel %vm28_vm2, %v16_v1, 0.0 }
  0x89   :  { %v41_v24 = vsel %vm29_vm0, %v37_v22, 0.0 }
  0x90   :  { %v32_v7 = vpop.xlane.xlu0 %31 }
  0x91   :  { %v44_v8 = vsub.f32 %v15_v0, %v32_v7 }
  0x93   :  { %v46_v9 = vmul.f32 1.442695, %v44_v8 }
  0x94   :  { %v35_v10 = vpop.xlane.xlu0 %34 }
  0x95   :  { %134 = vpow2.f32 %v46_v9  ;;  %v45_v12 = vsub.f32 %v16_v1, %v35_v10 }
  0x97   :  { %v48_v13 = vmul.f32 1.442695, %v45_v12 }
  0x99   :  { %136 = vpow2.f32 %v48_v13 }
  0x9f   :  { %v135_v17 = vpop.eup %134 }
  0xa0   :  { %v50_v19 = vsel %vm29_vm0, %v135_v17, 0.0 }
  0xa1   :  { %51 = vadd.xlane.f32.xlu0 %v50_v19 }
  0xa3   :  { %v137_v21 = vpop.eup %136 }
  0xa4   :  { %v53_v23 = vsel %vm29_vm0, %v137_v21, 0.0 }
  0xa5   :  { %39 = vadd.xlane.f32.xlu0 %v38_v20  ;;  %54 = vadd.xlane.f32.xlu1 %v53_v23 }
  0xa9   :  { %42 = vadd.xlane.f32.xlu0 %v41_v24 }
 0x12e   :  { %v52_v25 = vpop.xlane.xlu0 %51 }
 0x12f   :  { %138 = vlog2.f32 %v52_v25 }
 0x132   :  { %v55_v26 = vpop.xlane.xlu1 %54  ;;  %v40_v27 = vpop.xlane.xlu0 %39 }
 0x133   :  { %140 = vlog2.f32 %v55_v26  ;;  %v56_v30 = vsub.f32 %v40_v27, %v32_v7 }
 0x136   :  { %v43_v31 = vpop.xlane.xlu0 %42 }
 0x137   :  { %v57_v36 = vsub.f32 %v43_v31, %v35_v10 }
 0x139   :  { %v139_v28 = vpop.eup %138 }
 0x13a   :  { %v59_v29 = vmul.f32 0.6931472, %v139_v28 }
 0x13c   :  { %v62_v32 = vsub.f32 %v56_v30, %v59_v29 }
 0x13d   :  { %v141_v33 = vpop.eup %140 }
 0x13e   :  { %v61_v34 = vmul.f32 0.6931472, %v141_v33  ;;  %v64_v35 = vmax.f32 %v62_v32, -87.33655 }
 0x140   :  { %v66_v37 = vmul.f32 1.442695, %v64_v35  ;;  %v63_v38 = vsub.f32 %v57_v36, %v61_v34 }
 0x142   :  { %142 = vpow2.f32 %v66_v37  ;;  %v65_v39 = vmax.f32 %v63_v38, -87.33655 }
 0x144   :  { %v68_v40 = vmul.f32 1.442695, %v65_v39 }
 0x146   :  { %144 = vpow2.f32 %v68_v40 }
 0x14c   :  { %v143_v41 = vpop.eup %142 }
 0x14d   :  { %v70_v42 = vsub.f32 1.0, %v143_v41 }
 0x14f   :  { %v72_v43 = vmax.f32 %v70_v42, 0.0 }
 0x150   :  { %v145_v44 = vpop.eup %144 }
 0x151   :  { %v74_v45 = vmul.f32 %v72_v43, %v72_v43  ;;  %v71_v46 = vsub.f32 1.0, %v145_v44 }
 0x153   :  { %v76_v47 = vmul.f32 -0.25, %v74_v45  ;;  %v73_v48 = vmax.f32 %v71_v46, 0.0 }
 0x155   :  { %v78_v50 = vmul.f32 %v76_v47, %v64_v35  ;;  %v75_v51 = vmul.f32 %v73_v48, %v73_v48 }
 0x157   :  { %v77_v52 = vmul.f32 -0.25, %v75_v51  ;;  %v82_v53 = vmul.f32 %v80_v49, %v78_v50 }
 0x159   :  { %v79_v55 = vmul.f32 %v77_v52, %v65_v39  ;;  %v97_v57 = vsel %vm91_vm3, %v82_v53, 0.0 }
 0x15a   :  { %v100_v59 = vsel %vm99_vm5, %v97_v57, 0.0 }
 0x15b   :  { %v83_v56 = vmul.f32 %v81_v54, %v79_v55 }
 0x15d   :  { %v98_v58 = vsel %vm92_vm4, %v83_v56, 0.0 }
 0x15e   :  { %v101_v60 = vsel %vm99_vm5, %v98_v58, 0.0 }
 0x15f   :  { %v102_v61 = vadd.f32 %v101_v60, %v100_v59 }
 0x161   :  { %103 = vadd.xlane.f32.xlu0 %v102_v61 }
 0x1ee   :  { %v104_v62 = vpop.xlane.xlu0 %103 }
 0x1ef   :  { %v105_v63 = vrot.slane %v104_v62, 4 }
 0x1f1   :  { %v106_v0 = vadd.f32 %v105_v63, %v104_v62 }
 0x1f3   :  { %v107_v1 = vrot.slane %v106_v0, 2 }
 0x1f5   :  { %v108_v2 = vadd.f32 %v107_v1, %v106_v0 }
 0x1f7   :  { %v109_v3 = vrot.slane %v108_v2, 1 }
 0x1f9   :  { %v110_v4 = vadd.f32 %v109_v3, %v108_v2 }
 0x1fb   :  { %128 = vpush %v110_v4 }
 0x22c   :  { %s129_s23 = spop %128 }
 0x22d   :  { %v112_v5 = vstv %s129_s23 }
 0x22e   :  { %113 = vst [vmem:[#allocation2] sm:$0x1] %v112_v5 }
 0x22f   :  { %157 = shalt.err (!%p154_p4)
}
 0x230   :  { %s158_s28 = scalar_lea.hbm %s239_s3, 16 }
 0x231   :  { %p159_p5 = scmp.ne.s32.totalorder %s239_s3, %s158_s28  ;;  %p162_p6 = scmp.lt.u32.totalorder %s158_s28, %s239_s3 }
 0x233   :  { %p164_p7 = pnand %p162_p6, %p159_p5 }
 0x235   :  { %167 = shalt.err (!%p164_p7)
}
 0x236   :  { %123 = dma.vmem_to_hbm [thread:$0]  %s121_s22, 16, %s239_s3, [#allocation3]  }
 0x237   :  { %168 = dma.done.wait [#allocation3], 16  }
 0x238   :  { %169 = vsyncadd [#allocation3], 4294967280 }
 0x239   :  { %127 = vsyncpa [#allocation3], 1 }

</bundles_post_ra>
